<compile_context>
chip_gen: v6e
topology: v6e:2x2x1
jax: 0.10.0
libtpu: 0.0.40
codegen_flags: <defaults>
</compile_context>

<pallas_src>
import numpy as np
import jax
import jax.numpy as jnp
from jax.experimental import pallas as pl
from jax.experimental.pallas import tpu as pltpu


FEAT_PAD = 16  # feature-dim padding: covers f32 (8) and bf16 (16) sublane tiles


def _round_up(x, m):
    return (x + m - 1) // m * m


def _make_widedeep_kernel(n_hidden, d_pad, wd_pad, mm_dtype):
    """Kernel for a WideDeep model with `n_hidden` hidden layers (n_class == 1).

    Ref order: x_all (deep rows then wide rows, transposed), (W_i, b_i) * n_hidden,
               w_out_deep, w_out_wide, b_out, out.
    x_all is (d_pad + wd_pad, TB) in mm_dtype with batch on the lane axis.
    """

    def kernel(*refs):
        x_ref = refs[0]
        out_ref = refs[-1]
        idx = 1

        # Static, sublane-aligned splits of the single streamed operand.
        x = x_ref[:d_pad, :]            # (d_pad, TB)   mm_dtype
        wide = x_ref[d_pad:, :]         # (wd_pad, TB)  mm_dtype

        for _ in range(n_hidden):
            w_ref, b_ref = refs[idx], refs[idx + 1]
            idx += 2
            # Weights are pre-cast to mm_dtype host-side; only the (small) f32
            # activation from the previous relu needs a per-step cast.
            xm = x if x.dtype == mm_dtype else x.astype(mm_dtype)
            # y = relu(W @ x + b); W is PyTorch (out_features, in_features).
            # bf16 feeds the MXU; accumulation and elementwise stay f32.
            x = jnp.maximum(
                jnp.dot(w_ref[...], xm, preferred_element_type=jnp.float32)
                + b_ref[...],
                0.0,
            )
            # Dropout is identity at inference.

        wod_ref, wow_ref, bo_ref = refs[idx], refs[idx + 1], refs[idx + 2]
        # n_class == 1 output neuron: elementwise multiply (VPU) + sublane
        # reduction (XLU) instead of two N=1 MXU matmuls; output.weight acts on
        # cat([x_deep, X_w]).  Result is already a lane-dense (1, TB) row.
        logits = (
            jnp.sum(wod_ref[...] * x, axis=0, keepdims=True)
            + jnp.sum(wow_ref[...] * wide.astype(jnp.float32), axis=0, keepdims=True)
            + bo_ref[...]
        )
        out_ref[...] = jax.nn.sigmoid(logits)  # compile(method='logistic')

    return kernel


def widedeep_forward_pallas(deep_inp, x_wide, hidden_ws, hidden_bs, w_out, b_out,
                            *, tile_b=2048, mm_dtype=jnp.bfloat16):
    """Runs the WideDeep MLP + output neuron inside one Pallas kernel.

    Args:
      deep_inp:  (B, deep_in_dim) f32 -- embeddings ++ continuous (already concatenated).
      x_wide:    (B, wide_dim)    f32.
      hidden_ws: list of (h_out, h_in) f32  (PyTorch nn.Linear layout).
      hidden_bs: list of (h_out,)    f32.
      w_out:     (n_class, h_last + wide_dim) f32 (PyTorch layout of self.output).
      b_out:     (n_class,) f32.
    Returns: (B, n_class) sigmoid outputs.
    """
    B, D = deep_inp.shape
    Wd = x_wide.shape[1]
    n_hidden = len(hidden_ws)
    n_class = w_out.shape[0]
    h_last = hidden_ws[-1].shape[0]
    assert w_out.shape[1] == h_last + Wd
    assert n_class == 1, "kernel specialized for the logistic / n_class==1 head"

    f32 = jnp.float32

    # ---- batch tiling (lane axis) ----
    B128 = _round_up(max(B, 1), 128)
    tb = min(_round_up(tile_b, 128), B128)
    if B128 >= 256:
        # Ensure >= 2 grid steps so dimension_semantics=("parallel",) can shard
        # the batch across both v7x TensorCores.
        tb = min(tb, _round_up((B128 + 1) // 2, 128))
    B_pad = _round_up(B128, tb)
    num_tiles = B_pad // tb

    # ---- feature padding (sublane tile, not 128) ----
    D_pad = _round_up(D, FEAT_PAD)
    Wd_pad = _round_up(Wd, FEAT_PAD)
    n_feat = D_pad + Wd_pad

    # Single transposed + zero-padded + pre-cast activation operand:
    # rows [0, D_pad) = deep input, rows [D_pad, D_pad+Wd_pad) = wide input.
    x_all = jnp.zeros((n_feat, B_pad), mm_dtype)
    x_all = x_all.at[:D, :B].set(deep_inp.T.astype(mm_dtype))
    x_all = x_all.at[D_pad:D_pad + Wd, :B].set(x_wide.T.astype(mm_dtype))

    operands = [x_all]
    in_specs = [pl.BlockSpec((n_feat, tb), lambda i: (0, i))]

    flops = 0
    prev_pad = D_pad
    for w, b in zip(hidden_ws, hidden_bs):
        h = w.shape[0]
        h_pad = _round_up(h, FEAT_PAD)
        # Weights pre-cast to mm_dtype host-side (no per-step cast in kernel);
        # biases stay f32 for the f32 epilogue.  Zero padding is exact.
        w_p = jnp.zeros((h_pad, prev_pad), mm_dtype).at[:h, :w.shape[1]].set(
            w.astype(mm_dtype))
        b_p = jnp.zeros((h_pad, 1), f32).at[:h, 0].set(b.astype(f32))
        operands += [w_p, b_p]
        # Constant index_map -> weights/biases stay VMEM-resident across tiles.
        in_specs += [
            pl.BlockSpec(w_p.shape, lambda i: (0, 0)),
            pl.BlockSpec(b_p.shape, lambda i: (0, 0)),
        ]
        flops += 2 * h_pad * prev_pad * B_pad
        prev_pad = h_pad

    # Split the output weight into its deep / wide blocks (== cat form); kept f32
    # since they feed the VPU multiply + sublane reduction, not the MXU.
    wod = w_out[:, :h_last].astype(f32)   # (1, h_last)
    wow = w_out[:, h_last:].astype(f32)   # (1, wide_dim)
    wod_p = jnp.zeros((prev_pad, 1), f32).at[:h_last, 0].set(wod[0])
    wow_p = jnp.zeros((Wd_pad, 1), f32).at[:Wd, 0].set(wow[0])
    bo_p = jnp.reshape(b_out.astype(f32), (1, 1))
    operands += [wod_p, wow_p, bo_p]
    in_specs += [
        pl.BlockSpec(wod_p.shape, lambda i: (0, 0)),
        pl.BlockSpec(wow_p.shape, lambda i: (0, 0)),
        pl.BlockSpec(bo_p.shape, lambda i: (0, 0)),
    ]
    flops += 2 * (prev_pad + Wd_pad) * B_pad

    # Lane-dense output: (1, B_pad) with a (1, tb) block per grid step.
    out_spec = pl.BlockSpec((1, tb), lambda i: (0, i))
    bytes_accessed = int(sum(int(o.nbytes) for o in operands) + B_pad * 4)

    out = pl.pallas_call(
        _make_widedeep_kernel(n_hidden, D_pad, Wd_pad, mm_dtype),
        out_shape=jax.ShapeDtypeStruct((1, B_pad), f32),
        grid=(num_tiles,),
        in_specs=in_specs,
        out_specs=out_spec,
        compiler_params=pltpu.CompilerParams(
            dimension_semantics=("parallel",),   # shards batch tiles across v7x TCs
            vmem_limit_bytes=32 * 1024 * 1024,   # tiny footprint; fits all gens
        ),
        cost_estimate=pl.CostEstimate(
            flops=int(flops),
            transcendentals=int(B_pad),          # one sigmoid per padded batch column
            bytes_accessed=bytes_accessed,
        ),
    )(*operands)

    return out[0, :B].reshape(B, n_class)


def reference_forward(deep_inp, x_wide, hidden_ws, hidden_bs, w_out, b_out):
    """Pure-JAX f32 reference matching the PyTorch forward (eval mode, logistic)."""
    x = deep_inp
    for w, b in zip(hidden_ws, hidden_bs):
        x = jnp.maximum(x @ w.T + b, 0.0)
    cat = jnp.concatenate([x, x_wide], axis=1)
    return jax.nn.sigmoid(cat @ w_out.T + b_out)


if __name__ == "__main__":
    # ---- model configuration (mirrors WideDeep.__init__) ----
    batch = 8
    wide_dim = 16
    embeddings_input = [("col_a", 10, 8), ("col_b", 12, 8), ("col_c", 7, 8)]
    continuous_cols = ["cont_0", "cont_1"]
    hidden_layers = [32, 16]
    n_class = 1

    emb_total = sum(e[2] for e in embeddings_input)
    deep_in_dim = emb_total + len(continuous_cols)

    # ---- deterministic parameter init ----
    key = jax.random.PRNGKey(0)
    keys = iter(jax.random.split(key, 32))

    emb_tables = {
        col: 0.1 * jax.random.normal(next(keys), (val, dim), dtype=jnp.float32)
        for col, val, dim in embeddings_input
    }

    # nn.Linear layout: weight is (out_features, in_features)
    hidden_ws, hidden_bs = [], []
    prev = deep_in_dim
    for h in hidden_layers:
        hidden_ws.append(0.1 * jax.random.normal(next(keys), (h, prev), dtype=jnp.float32))
        hidden_bs.append(0.1 * jax.random.normal(next(keys), (h,), dtype=jnp.float32))
        prev = h
    w_out = 0.1 * jax.random.normal(
        next(keys), (n_class, hidden_layers[-1] + wide_dim), dtype=jnp.float32)
    b_out = 0.1 * jax.random.normal(next(keys), (n_class,), dtype=jnp.float32)

    # ---- deterministic example inputs ----
    x_wide = jax.random.normal(next(keys), (batch, wide_dim), dtype=jnp.float32)
    # Categorical indices kept as integers end-to-end (no float round trip).
    cat_idx = {
        "col_a": jax.random.randint(next(keys), (batch,), 0, 10),
        "col_b": jax.random.randint(next(keys), (batch,), 0, 12),
        "col_c": jax.random.randint(next(keys), (batch,), 0, 7),
    }
    cont_vals = jax.random.normal(next(keys), (batch, len(continuous_cols)), dtype=jnp.float32)

    # ---- glue: embedding lookups + concat (matches torch forward's emb + cont cat) ----
    emb_list = [emb_tables[col][cat_idx[col]] for col, _, _ in embeddings_input]
    deep_inp = jnp.concatenate(emb_list + [cont_vals], axis=1)
    assert deep_inp.shape == (batch, deep_in_dim)

    # ---- run the Pallas kernel (bf16 operands, f32 accumulation/epilogue) ----
    out = widedeep_forward_pallas(deep_inp, x_wide, hidden_ws, hidden_bs, w_out, b_out)
    out = jax.block_until_ready(out)

    # sanity check against the pure-JAX f32 reference; tolerance loosened for the
    # bf16 matmul operands (expected precision loss, not a bug).
    ref = reference_forward(deep_inp, x_wide, hidden_ws, hidden_bs, w_out, b_out)
    np.testing.assert_allclose(np.asarray(out), np.asarray(ref), rtol=2e-2, atol=2e-2)

    print("KERNEL_OK")
</pallas_src>

<mosaic_0001>
module attributes {stable_mosaic.version = 11 : i64} {
  func.func @kernel(%arg0: i32, %arg1: memref<48x128xbf16, #tpu.memory_space<vmem>>, %arg2: memref<32x32xbf16, #tpu.memory_space<vmem>>, %arg3: memref<32x1xf32, #tpu.memory_space<vmem>>, %arg4: memref<16x32xbf16, #tpu.memory_space<vmem>>, %arg5: memref<16x1xf32, #tpu.memory_space<vmem>>, %arg6: memref<16x1xf32, #tpu.memory_space<vmem>>, %arg7: memref<16x1xf32, #tpu.memory_space<vmem>>, %arg8: memref<1x1xf32, #tpu.memory_space<vmem>>, %arg9: memref<1x128xf32, #tpu.memory_space<vmem>>) attributes {dimension_semantics = [#tpu.dimension_semantics<parallel>], iteration_bounds = array<i64: 1>, scalar_prefetch = 0 : i64, scratch_operands = 0 : i64, tpu.core_type = #tpu.core_type<tc>, window_params = [{transform_indices = @transform_0, window_bounds = array<i64: 48, 128>}, {pipeline_mode = #tpu.pipeline_mode<synchronous>, transform_indices = @transform_1, window_bounds = array<i64: 32, 32>}, {pipeline_mode = #tpu.pipeline_mode<synchronous>, transform_indices = @transform_2, window_bounds = array<i64: 32, 1>}, {pipeline_mode = #tpu.pipeline_mode<synchronous>, transform_indices = @transform_3, window_bounds = array<i64: 16, 32>}, {pipeline_mode = #tpu.pipeline_mode<synchronous>, transform_indices = @transform_4, window_bounds = array<i64: 16, 1>}, {pipeline_mode = #tpu.pipeline_mode<synchronous>, transform_indices = @transform_5, window_bounds = array<i64: 16, 1>}, {pipeline_mode = #tpu.pipeline_mode<synchronous>, transform_indices = @transform_6, window_bounds = array<i64: 16, 1>}, {pipeline_mode = #tpu.pipeline_mode<synchronous>, transform_indices = @transform_7, window_bounds = array<i64: 1, 1>}, {transform_indices = @transform_8, window_bounds = array<i64: 1, 128>}]} {
    %c0 = arith.constant 0 : index
    %c0_0 = arith.constant 0 : index
    %0 = vector.load %arg1[%c0, %c0_0] : memref<48x128xbf16, #tpu.memory_space<vmem>>, vector<32x128xbf16>
    %c32 = arith.constant 32 : index
    %c0_1 = arith.constant 0 : index
    %1 = vector.load %arg1[%c32, %c0_1] : memref<48x128xbf16, #tpu.memory_space<vmem>>, vector<16x128xbf16>
    %c0_2 = arith.constant 0 : index
    %c0_3 = arith.constant 0 : index
    %2 = vector.load %arg2[%c0_2, %c0_3] : memref<32x32xbf16, #tpu.memory_space<vmem>>, vector<32x32xbf16>
    %cst = arith.constant dense<0.000000e+00> : vector<32x128xf32>
    %3 = tpu.matmul %2, %0, %cst {dimension_numbers = #tpu.dot_dimension_numbers<[1], [0], [0], [1], [0, 0, 1, 1], [], []>} : vector<32x32xbf16>, vector<32x128xbf16>, vector<32x128xf32> -> vector<32x128xf32>
    %c0_4 = arith.constant 0 : index
    %c0_5 = arith.constant 0 : index
    %4 = vector.load %arg3[%c0_4, %c0_5] : memref<32x1xf32, #tpu.memory_space<vmem>>, vector<32x1xf32>
    %5 = vector.broadcast %4 : vector<32x1xf32> to vector<32x128xf32>
    %6 = arith.addf %3, %5 : vector<32x128xf32>
    %cst_6 = arith.constant 0.000000e+00 : f32
    %7 = vector.broadcast %cst_6 : f32 to vector<32x128xf32>
    %8 = arith.maximumf %6, %7 : vector<32x128xf32>
    %9 = arith.truncf %8 : vector<32x128xf32> to vector<32x128xbf16>
    %c0_7 = arith.constant 0 : index
    %c0_8 = arith.constant 0 : index
    %10 = vector.load %arg4[%c0_7, %c0_8] : memref<16x32xbf16, #tpu.memory_space<vmem>>, vector<16x32xbf16>
    %cst_9 = arith.constant dense<0.000000e+00> : vector<16x128xf32>
    %11 = tpu.matmul %10, %9, %cst_9 {dimension_numbers = #tpu.dot_dimension_numbers<[1], [0], [0], [1], [0, 0, 1, 1], [], []>} : vector<16x32xbf16>, vector<32x128xbf16>, vector<16x128xf32> -> vector<16x128xf32>
    %c0_10 = arith.constant 0 : index
    %c0_11 = arith.constant 0 : index
    %12 = vector.load %arg5[%c0_10, %c0_11] : memref<16x1xf32, #tpu.memory_space<vmem>>, vector<16x1xf32>
    %13 = vector.broadcast %12 : vector<16x1xf32> to vector<16x128xf32>
    %14 = arith.addf %11, %13 : vector<16x128xf32>
    %cst_12 = arith.constant 0.000000e+00 : f32
    %15 = vector.broadcast %cst_12 : f32 to vector<16x128xf32>
    %16 = arith.maximumf %14, %15 : vector<16x128xf32>
    %c0_13 = arith.constant 0 : index
    %c0_14 = arith.constant 0 : index
    %17 = vector.load %arg6[%c0_13, %c0_14] : memref<16x1xf32, #tpu.memory_space<vmem>>, vector<16x1xf32>
    %18 = vector.broadcast %17 : vector<16x1xf32> to vector<16x128xf32>
    %19 = arith.mulf %18, %16 : vector<16x128xf32>
    %cst_15 = arith.constant dense<0.000000e+00> : vector<128xf32>
    %20 = vector.multi_reduction <add>, %19, %cst_15 [0] : vector<16x128xf32> to vector<128xf32>
    %21 = vector.shape_cast %20 : vector<128xf32> to vector<1x128xf32>
    %c0_16 = arith.constant 0 : index
    %c0_17 = arith.constant 0 : index
    %22 = vector.load %arg7[%c0_16, %c0_17] : memref<16x1xf32, #tpu.memory_space<vmem>>, vector<16x1xf32>
    %23 = arith.extf %1 : vector<16x128xbf16> to vector<16x128xf32>
    %24 = vector.broadcast %22 : vector<16x1xf32> to vector<16x128xf32>
    %25 = arith.mulf %24, %23 : vector<16x128xf32>
    %cst_18 = arith.constant dense<0.000000e+00> : vector<128xf32>
    %26 = vector.multi_reduction <add>, %25, %cst_18 [0] : vector<16x128xf32> to vector<128xf32>
    %27 = vector.shape_cast %26 : vector<128xf32> to vector<1x128xf32>
    %28 = arith.addf %21, %27 : vector<1x128xf32>
    %c0_19 = arith.constant 0 : index
    %c0_20 = arith.constant 0 : index
    %29 = vector.load %arg8[%c0_19, %c0_20] : memref<1x1xf32, #tpu.memory_space<vmem>>, vector<1x1xf32>
    %30 = vector.broadcast %29 : vector<1x1xf32> to vector<1x128xf32>
    %31 = arith.addf %28, %30 : vector<1x128xf32>
    %32 = arith.negf %31 : vector<1x128xf32>
    %33 = math.exp %32 : vector<1x128xf32>
    %cst_21 = arith.constant 1.000000e+00 : f32
    %34 = vector.broadcast %cst_21 : f32 to vector<1x128xf32>
    %35 = arith.addf %34, %33 : vector<1x128xf32>
    %36 = arith.divf %34, %35 : vector<1x128xf32>
    %c0_22 = arith.constant 0 : index
    %c0_23 = arith.constant 0 : index
    %37 = vector.load %arg9[%c0_22, %c0_23] : memref<1x128xf32, #tpu.memory_space<vmem>>, vector<1x128xf32>
    tpu.vector_store %arg9[%c0_22, %c0_23], %36 {strides = array<i32>} : memref<1x128xf32, #tpu.memory_space<vmem>>, vector<1x128xf32>,
    return
  }
  func.func @transform_0(%arg0: i32) -> (i32, i32) {
    %c0_i32 = arith.constant 0 : i32
    %c0_i32_0 = arith.constant 0 : i32
    return %c0_i32, %arg0 : i32, i32
  }
  func.func @transform_1(%arg0: i32) -> (i32, i32) {
    %c0_i32 = arith.constant 0 : i32
    %c0_i32_0 = arith.constant 0 : i32
    %c0_i32_1 = arith.constant 0 : i32
    return %c0_i32, %c0_i32_0 : i32, i32
  }
  func.func @transform_2(%arg0: i32) -> (i32, i32) {
    %c0_i32 = arith.constant 0 : i32
    %c0_i32_0 = arith.constant 0 : i32
    %c0_i32_1 = arith.constant 0 : i32
    return %c0_i32, %c0_i32_0 : i32, i32
  }
  func.func @transform_3(%arg0: i32) -> (i32, i32) {
    %c0_i32 = arith.constant 0 : i32
    %c0_i32_0 = arith.constant 0 : i32
    %c0_i32_1 = arith.constant 0 : i32
    return %c0_i32, %c0_i32_0 : i32, i32
  }
  func.func @transform_4(%arg0: i32) -> (i32, i32) {
    %c0_i32 = arith.constant 0 : i32
    %c0_i32_0 = arith.constant 0 : i32
    %c0_i32_1 = arith.constant 0 : i32
    return %c0_i32, %c0_i32_0 : i32, i32
  }
  func.func @transform_5(%arg0: i32) -> (i32, i32) {
    %c0_i32 = arith.constant 0 : i32
    %c0_i32_0 = arith.constant 0 : i32
    %c0_i32_1 = arith.constant 0 : i32
    return %c0_i32, %c0_i32_0 : i32, i32
  }
  func.func @transform_6(%arg0: i32) -> (i32, i32) {
    %c0_i32 = arith.constant 0 : i32
    %c0_i32_0 = arith.constant 0 : i32
    %c0_i32_1 = arith.constant 0 : i32
    return %c0_i32, %c0_i32_0 : i32, i32
  }
  func.func @transform_7(%arg0: i32) -> (i32, i32) {
    %c0_i32 = arith.constant 0 : i32
    %c0_i32_0 = arith.constant 0 : i32
    %c0_i32_1 = arith.constant 0 : i32
    return %c0_i32, %c0_i32_0 : i32, i32
  }
  func.func @transform_8(%arg0: i32) -> (i32, i32) {
    %c0_i32 = arith.constant 0 : i32
    %c0_i32_0 = arith.constant 0 : i32
    return %c0_i32, %arg0 : i32, i32
  }
}

</mosaic_0001>

<bundles_post_ra>
// kernel: tpu_custom_call.1
= control target key start
LH: loop header
LB: loop body
LE: loop exit
PB: predicated region body
PF: predicated region fallthrough
CT: control target
= control target key end

     0   :  { %s473_s0 = inlined_call_operand.vmem [shape: bf16[48,128], index: 0, kind: input, shape index: {}]   ;;  %s474_s1 = inlined_call_operand.vmem [shape: bf16[32,32], index: 1, kind: input, shape index: {}]   ;;  %s475_s2 = inlined_call_operand.vmem [shape: f32[32,1], index: 2, kind: input, shape index: {}]   ;;  %s476_s3 = inlined_call_operand.vmem [shape: bf16[16,32], index: 3, kind: input, shape index: {}]   ;;  %s477_s4 = inlined_call_operand.vmem [shape: f32[16,1], index: 4, kind: input, shape index: {}]   ;;  %s478_s5 = inlined_call_operand.vmem [shape: f32[16,1], index: 5, kind: input, shape index: {}]   ;;  %s479_s6 = inlined_call_operand.vmem [shape: f32[16,1], index: 6, kind: input, shape index: {}]   ;;  %s480_s7 = inlined_call_operand.<no memory space> [shape: f32[1,1], index: 7, kind: input, shape index: {}]   ;;  %s481_s8 = inlined_call_operand.hbm [shape: f32[1,128], index: 8, kind: output, shape index: {}]  }
   0x1   :  { %v13_v0 = vstv %s480_s7 }
   0x2   :  { %14 = vst [vmem:[#allocation2] sm:$0x1] %v13_v0 }
   0x3   :  { %v336_v1 = vld [vmem:[%s473_s0 + $0x8] sm:$0xff]   ;;  %vm89_vm0 = vcmask 261120   ;;  %v337_v2 = vld [vmem:[%s473_s0] sm:$0xff]   ;;  %v367_v4 = vmov 0   ;;  %v45_v5 = vld [vmem:[%s475_s2 + $0x10] sm:$0xff] }
   0x4   :  { %314 = vmatprep.subr.bf16.mxu0 %v336_v1  ;;  %v338_v3 = vld [vmem:[%s474_s1] sm:$0xff]   ;;  %335 = vset.pattern.permute.xlu1 %v367_v4  ;;  %v339_v7 = vld [vmem:[%s474_s1 + $0x8] sm:$0xff]   ;;  %v46_v8 = vld [vmem:[%s475_s2 + $0x18] sm:$0xff] }
   0x5   :  { %315 = vmatpush3.bf16.msra.mxu0 %v336_v1  ;;  %334 = vset.pattern.permute.xlu0 %v367_v4  ;;  %v43_v6 = vld [vmem:[%s475_s2] sm:$0xff]  ;;  %v44_v9 = vld [vmem:[%s475_s2 + $0x8] sm:$0xff] }
   0x6   :  { %316 = vmatprep.subr.bf16.mxu0 %v337_v2  ;;  %318 = vmatprep.mubr.msk.bf16.mxu0 %vm89_vm0, %v338_v3 }
   0x7   :  { %59 = vperm.xlu0 %334, %v45_v5   ;;  %49 = vperm.xlu1 %335, %v43_v6  }
   0x9   :  { %317 = vmatpush3.bf16.msra.mxu0 %v337_v2 }
   0xa   :  { %15 = vsyncpa [#allocation4], 0  ;;  %v153_v10 = vld [vmem:[%s477_s4] sm:$0xff]  ;;  %v154_v11 = vld [vmem:[%s477_s4 + $0x8] sm:$0xff]  ;;  %v368_v17 = vmov 0.0   ;;  %vm369_vm1 = vmmov 0   ;;  %v267_v63 = vlaneseq }
   0xb   :  { %64 = vperm.xlu0 %334, %v46_v8   ;;  %54 = vperm.xlu1 %335, %v44_v9   ;;  %v216_v12 = vld [vmem:[%s478_s5] sm:$0xff]  ;;  %v217_v13 = vld [vmem:[%s478_s5 + $0x8] sm:$0xff]  ;;  %v306_v41 = vld [vmem:[%s473_s0 + $0x10] sm:$0xff]   ;;  %s370_s0 = smov [#allocation3]  }
   0xc   :  { %319 = vmatmul.mubr.msk.bf16.vlgmr.msra.gmra.mxu0 %vm89_vm0, %v339_v7  ;;  %v237_v14 = vld [vmem:[%s479_s6] sm:$0xff]  ;;  %v238_v15 = vld [vmem:[%s479_s6 + $0x8] sm:$0xff]  ;;  %322 = vmatprep.subr.bf16.mxu1 %v368_v17  ;;  %v304_v42 = vunpack.c.l.bf16 %v306_v41  ;;  %v305_v43 = vunpack.c.h.bf16 %v306_v41  ;;  %v268_v3 = vshrl.u32 %v267_v63, 7 }
   0xd   :  { %v261_v16 = vld [vmem:[#allocation2] sm:$0x1]  ;;  %326 = vmatprep.mubr.msk.bf16.mxu1 %vm369_vm1, %v368_v17 }
   0xe   :  { %v340_v36 = vld [vmem:[%s476_s3] sm:$0xff]   ;;  %v269_v7 = vsub.s32 0, %v268_v3  ;;  %s285_s3 = sshll.u32 %s370_s0, 4  ;;  %s286_s3 = int_to_ptr.vmem [resolvable:$true] %s285_s3 }
   0xf   :  { %157 = vperm.xlu0 %334, %v153_v10   ;;  %162 = vperm.xlu1 %335, %v154_v11   ;;  %s345_s11 = scalar_lea.vmem %s286_s3, 16  ;;  %s349_s12 = scalar_lea.vmem %s286_s3, 32 }
  0x10   :  { %p346_p0 = scmp.ne.s32.totalorder %s286_s3, %s345_s11  ;;  %p350_p1 = scmp.lt.s32.totalorder %s286_s3, %s286_s3 }
  0x11   :  { %p351_p2 = scmp.lt.s32.totalorder %s349_s12, %s345_s11 }
  0x13   :  { %220 = vperm.xlu0 %334, %v216_v12   ;;  %225 = vperm.xlu1 %335, %v217_v13   ;;  %p352_p3 = por %p351_p2, %p350_p1 }
  0x15   :  { %p353_p4 = pnand %p352_p3, %p346_p0 }
  0x17   :  { %243 = vperm.xlu0 %334, %v237_v14   ;;  %248 = vperm.xlu1 %335, %v238_v15  }
  0x1b   :  { %264 = vperm.xlu0 %334, %v261_v16  }
  0x82   :  { %v60_v18 = vpop.permute.xlu0 %59  ;;  %v50_v19 = vpop.permute.xlu1 %49 }
  0x86   :  { %v65_v23 = vpop.permute.xlu0 %64  ;;  %v55_v26 = vpop.permute.xlu1 %54 }
  0x8a   :  { %v158_v37 = vpop.permute.xlu0 %157  ;;  %v163_v38 = vpop.permute.xlu1 %162 }
  0x8e   :  { %v221_v39 = vpop.permute.xlu0 %220  ;;  %v226_v40 = vpop.permute.xlu1 %225 }
  0x92   :  { %v244_v44 = vpop.permute.xlu0 %243  ;;  %v249_v45 = vpop.permute.xlu1 %248 }
  0x93   :  { %v251_v46 = vmul.f32 %v304_v42, %v244_v44  ;;  %v252_v47 = vmul.f32 %v305_v43, %v249_v45 }
  0x95   :  { %v253_v48 = vadd.f32 %v252_v47, %v251_v46 }
  0x96   :  { %v265_v9 = vpop.permute.xlu0 %264 }
  0x97   :  { %v254_v52 = vrot.slane %v253_v48, 4  ;;  %v270_v12 = vrot.slane %v265_v9, %v269_v7 }
  0x99   :  { %v255_v57 = vadd.f32 %v254_v52, %v253_v48 }
  0x9b   :  { %v256_v61 = vrot.slane %v255_v57, 2 }
  0x9d   :  { %v257_v1 = vadd.f32 %v256_v61, %v255_v57 }
  0x9f   :  { %v258_v5 = vrot.slane %v257_v1, 1 }
  0xa1   :  { %v259_v10 = vadd.f32 %v258_v5, %v257_v1 }
  0xcc   :  { %v320_v20 = vpop.f32.mrf.mxu0 }
  0xcd   :  { %v139_v22 = vadd.f32 %v320_v20, %v60_v18 }
  0xce   :  { %v130_v21 = vpop.f32.mrf.mxu0 }
  0xcf   :  { %v147_v28 = vmax.f32 %v139_v22, 0.0  ;;  %v131_v29 = vadd.f32 %v130_v21, %v50_v19 }
  0xd0   :  { %v321_v24 = vpop.f32.mrf.mxu0 }
  0xd1   :  { %v142_v25 = vadd.f32 %v321_v24, %v65_v23  ;;  %v145_v34 = vmax.f32 %v131_v29, 0.0 }
  0xd2   :  { %v133_v27 = vpop.f32.mrf.mxu0 }
  0xd3   :  { %v148_v30 = vmax.f32 %v142_v25, 0.0  ;;  %v134_v31 = vadd.f32 %v133_v27, %v55_v26 }
  0xd5   :  { %v146_v32 = vmax.f32 %v134_v31, 0.0  ;;  %v150_v33 = vpack.c.bf16 %v148_v30, %v147_v28 }
  0xd7   :  { %323 = vmatpush3.bf16.msra.mxu1 %v150_v33  ;;  %v149_v35 = vpack.c.bf16 %v146_v32, %v145_v34 }
  0xd8   :  { %324 = vmatprep.subr.bf16.mxu1 %v368_v17 }
  0xdb   :  { %325 = vmatpush3.bf16.msra.mxu1 %v149_v35 }
  0xde   :  { %327 = vmatmul.mubr.msk.bf16.vlgmr.msra.gmra.mxu1 %vm89_vm0, %v340_v36 }
 0x19e   :  { %v207_v49 = vpop.f32.mrf.mxu1 }
 0x19f   :  { %v208_v50 = vadd.f32 %v207_v49, %v158_v37 }
 0x1a0   :  { %v328_v51 = vpop.f32.mrf.mxu1 }
 0x1a1   :  { %v214_v54 = vmax.f32 %v208_v50, 0.0 }
 0x1a2   :  { %v210_v53 = vpop.f32.mrf.mxu1 }
 0x1a3   :  { %v211_v55 = vadd.f32 %v210_v53, %v163_v38  ;;  %v228_v59 = vmul.f32 %v221_v39, %v214_v54 }
 0x1a4   :  { %v329_v56 = vpop.f32.mrf.mxu1 }
 0x1a5   :  { %v215_v58 = vmax.f32 %v211_v55, 0.0 }
 0x1a7   :  { %v229_v60 = vmul.f32 %v226_v40, %v215_v58 }
 0x1a9   :  { %v230_v62 = vadd.f32 %v229_v60, %v228_v59 }
 0x1ab   :  { %v231_v0 = vrot.slane %v230_v62, 4 }
 0x1ad   :  { %v232_v2 = vadd.f32 %v231_v0, %v230_v62 }
 0x1af   :  { %v233_v4 = vrot.slane %v232_v2, 2 }
 0x1b1   :  { %v234_v6 = vadd.f32 %v233_v4, %v232_v2 }
 0x1b3   :  { %v235_v8 = vrot.slane %v234_v6, 1 }
 0x1b5   :  { %v236_v11 = vadd.f32 %v235_v8, %v234_v6 }
 0x1b7   :  { %v260_v13 = vadd.f32 %v259_v10, %v236_v11 }
 0x1b9   :  { %v271_v14 = vadd.f32 %v270_v12, %v260_v13 }
 0x1bb   :  { %v301_v15 = vmul.f32 -1.442695, %v271_v14 }
 0x1bd   :  { %341 = vpow2.f32 %v301_v15 }
 0x1ca   :  { %v342_v16 = vpop.eup %341 }
 0x1cb   :  { %v275_v17 = vadd.f32 1.0, %v342_v16 }
 0x1cd   :  { %343 = vrcp.f32 %v275_v17 }
 0x1da   :  { %v344_v18 = vpop.eup %343 }
 0x1db   :  { %278 = vst [vmem:[#allocation3] sm:$0x1] %v344_v18 }
 0x1dc   :  { %356 = shalt.err (!%p353_p4)
}
 0x1dd   :  { %288 = dma.vmem_to_hbm [thread:$0]  %s286_s3, 16, %s481_s8, [#allocation4]  }
 0x1de   :  { %365 = dma.done.wait [#allocation4], 16  }
 0x1df   :  { %366 = vsyncadd [#allocation4], 4294967280 }
 0x1e0   :  { %292 = vsyncpa [#allocation4], 1 }

</bundles_post_ra>
